<compile_context>
chip_gen: v7x
topology: tpu7x:2x2x1
jax: 0.10.0
libtpu: 0.0.40
codegen_flags: <defaults>
</compile_context>

<pallas_src>
import jax
import jax.numpy as jnp
from jax.experimental import pallas as pl
from jax.experimental.pallas import tpu as pltpu

H1 = 200            # original hidden widths (PyTorch module spec)
H2 = 100
H1_PAD = 256        # MXU/lane-native padded widths (zero padding is exact)
H2_PAD = 128
OUT_PAD = 8         # fused heads: cols 0:3 = out1, 3:6 = out2, 6:8 = zero pad


def mlp_kernel(x_ref, w1_ref, b1_ref, w2_ref, b2_ref, wo_ref, bo_ref, out_ref):
    x = x_ref[...]                                            # (TB, n) bf16 (cast in wrapper)

    # layer1 + leaky_relu(0.01): bf16 MXU matmul, f32 accumulate, f32 VPU ops
    h1 = jnp.dot(x, w1_ref[...], preferred_element_type=jnp.float32) + b1_ref[...]
    h1 = jnp.maximum(h1, 0.01 * h1)

    # layer2 + leaky_relu(0.01)
    h2 = jnp.dot(h1.astype(jnp.bfloat16), w2_ref[...],
                 preferred_element_type=jnp.float32) + b2_ref[...]
    h2 = jnp.maximum(h2, 0.01 * h2)

    # fused output heads: one (TB,128)@(128,8) matmul instead of two (.,100)@(100,3)
    ho = jnp.dot(h2.astype(jnp.bfloat16), wo_ref[...],
                 preferred_element_type=jnp.float32) + bo_ref[...]
    o1 = ho[:, 0:3]                                           # out1 (no activation)
    o2 = jnp.maximum(ho[:, 3:6], 0.0)                         # relu(out2)

    # cumsum over the 3-wide axis via two VPU adds (no MXU push, no in-kernel iota)
    c0 = o2[:, 0:1]
    c1 = c0 + o2[:, 1:2]
    c2 = c1 + o2[:, 2:3]
    res = o1 + jnp.concatenate([c0, c1, c2], axis=-1)         # (TB, 3)

    pad = jnp.zeros((res.shape[0], OUT_PAD - 3), jnp.float32)
    out_ref[...] = jnp.concatenate([res, pad], axis=-1)       # (TB, 8) full-block store


def _round8(v):
    return ((v + 7) // 8) * 8


def model_forward(x, packed_params, *, tb=2048):
    """x: (B, n).  packed_params from pack_params().  Returns (B, 3) f32."""
    w1, b1, w2, b2, wo, bo = packed_params
    B, n = x.shape

    # x is the dominant HBM stream -> ship it bf16 (MXU-native, half the DMA/VMEM).
    x = x.astype(jnp.bfloat16)

    # Batch tile: multiple of 8 sublanes, capped at `tb`, sized so the grid has
    # >= 2 steps whenever B > 8 (v7x: 2 TCs; a "parallel" axis only shards across
    # them with >= 2 iterations).  No jnp.pad: Pallas handles the ragged last block.
    TB = min(tb, _round8(pl.cdiv(B, 2)))
    grid = (pl.cdiv(B, TB),)

    def resident(shape):
        # Weights/biases: full-array block, same block every grid step (VMEM-resident).
        return pl.BlockSpec(shape, lambda i: (0, 0))

    out = pl.pallas_call(
        mlp_kernel,
        out_shape=jax.ShapeDtypeStruct((B, OUT_PAD), jnp.float32),
        grid=grid,
        in_specs=[
            pl.BlockSpec((TB, n), lambda i: (i, 0)),
            resident(w1.shape), resident(b1.shape),
            resident(w2.shape), resident(b2.shape),
            resident(wo.shape), resident(bo.shape),
        ],
        out_specs=pl.BlockSpec((TB, OUT_PAD), lambda i: (i, 0)),
        compiler_params=pltpu.CompilerParams(
            dimension_semantics=("parallel",)),
    )(x, w1, b1, w2, b2, wo, bo)

    return out[:, :3]


def init_params(key, n):
    """PyTorch nn.Linear-style init (U(-1/sqrt(fan_in), +)), weights stored (in, out)."""
    def linear(key, fan_in, fan_out):
        kw, kb = jax.random.split(key)
        bound = 1.0 / jnp.sqrt(fan_in)
        w = jax.random.uniform(kw, (fan_in, fan_out), jnp.float32, -bound, bound)
        b = jax.random.uniform(kb, (1, fan_out), jnp.float32, -bound, bound)
        return w, b

    k1, k2, k3, k4 = jax.random.split(key, 4)
    w1, b1 = linear(k1, n, H1)
    w2, b2 = linear(k2, H1, H2)
    wo1, bo1 = linear(k3, H2, 3)
    wo2, bo2 = linear(k4, H2, 3)
    return (w1, b1, w2, b2, wo1, bo1, wo2, bo2)


def pack_params(params):
    """Zero-pad to MXU-native widths, fuse the two heads, cast weights to bf16."""
    w1, b1, w2, b2, wo1, bo1, wo2, bo2 = params
    n = w1.shape[0]

    w1p = jnp.zeros((n, H1_PAD), jnp.float32).at[:, :H1].set(w1)
    b1p = jnp.zeros((1, H1_PAD), jnp.float32).at[:, :H1].set(b1)
    w2p = jnp.zeros((H1_PAD, H2_PAD), jnp.float32).at[:H1, :H2].set(w2)
    b2p = jnp.zeros((1, H2_PAD), jnp.float32).at[:, :H2].set(b2)

    wo = jnp.concatenate([wo1, wo2], axis=1)          # (H2, 6)
    bo = jnp.concatenate([bo1, bo2], axis=1)          # (1, 6)
    wop = jnp.zeros((H2_PAD, OUT_PAD), jnp.float32).at[:H2, :6].set(wo)
    bop = jnp.zeros((1, OUT_PAD), jnp.float32).at[:, :6].set(bo)

    # Weights bf16 (MXU-native, half the DMA); biases stay f32 (VPU adds in f32).
    return (w1p.astype(jnp.bfloat16), b1p,
            w2p.astype(jnp.bfloat16), b2p,
            wop.astype(jnp.bfloat16), bop)


def reference_forward(x, params):
    """Pure-JAX f32 reference in the original (unpadded) widths."""
    w1, b1, w2, b2, wo1, bo1, wo2, bo2 = params
    h1 = x @ w1 + b1
    h1 = jnp.where(h1 > 0, h1, 0.01 * h1)
    h2 = h1 @ w2 + b2
    h2 = jnp.where(h2 > 0, h2, 0.01 * h2)
    o1 = h2 @ wo1 + bo1
    o2 = jnp.maximum(h2 @ wo2 + bo2, 0.0)
    return o1 + jnp.cumsum(o2, axis=1)


if __name__ == "__main__":
    key = jax.random.PRNGKey(0)
    kx, kp = jax.random.split(key)

    B, n = 8, 32
    x = jax.random.normal(kx, (B, n), jnp.float32)
    params = init_params(kp, n)
    packed = pack_params(params)

    out = model_forward(x, packed)
    out = jax.block_until_ready(out)

    ref = reference_forward(x, params)
    assert out.shape == (B, 3)
    # bf16 inputs/weights with f32 accumulation vs f32 reference: ~1e-2-level agreement.
    assert jnp.allclose(out, ref, atol=2e-2, rtol=2e-2), "mismatch vs reference"

    print("KERNEL_OK")
</pallas_src>

<mosaic_0001>
module attributes {stable_mosaic.version = 11 : i64} {
  func.func @mlp_kernel(%arg0: i32, %arg1: memref<8x32xbf16, #tpu.memory_space<vmem>>, %arg2: memref<32x256xbf16, #tpu.memory_space<vmem>>, %arg3: memref<1x256xf32, #tpu.memory_space<vmem>>, %arg4: memref<256x128xbf16, #tpu.memory_space<vmem>>, %arg5: memref<1x128xf32, #tpu.memory_space<vmem>>, %arg6: memref<128x8xbf16, #tpu.memory_space<vmem>>, %arg7: memref<1x8xf32, #tpu.memory_space<vmem>>, %arg8: memref<8x8xf32, #tpu.memory_space<vmem>>) attributes {dimension_semantics = [#tpu.dimension_semantics<parallel>], iteration_bounds = array<i64: 1>, scalar_prefetch = 0 : i64, scratch_operands = 0 : i64, tpu.core_type = #tpu.core_type<tc>, window_params = [{transform_indices = @transform_0, window_bounds = array<i64: 8, 32>}, {pipeline_mode = #tpu.pipeline_mode<synchronous>, transform_indices = @transform_1, window_bounds = array<i64: 32, 256>}, {pipeline_mode = #tpu.pipeline_mode<synchronous>, transform_indices = @transform_2, window_bounds = array<i64: 1, 256>}, {pipeline_mode = #tpu.pipeline_mode<synchronous>, transform_indices = @transform_3, window_bounds = array<i64: 256, 128>}, {pipeline_mode = #tpu.pipeline_mode<synchronous>, transform_indices = @transform_4, window_bounds = array<i64: 1, 128>}, {pipeline_mode = #tpu.pipeline_mode<synchronous>, transform_indices = @transform_5, window_bounds = array<i64: 128, 8>}, {pipeline_mode = #tpu.pipeline_mode<synchronous>, transform_indices = @transform_6, window_bounds = array<i64: 1, 8>}, {transform_indices = @transform_7, window_bounds = array<i64: 8, 8>}]} {
    %c0 = arith.constant 0 : index
    %c0_0 = arith.constant 0 : index
    %0 = vector.load %arg1[%c0, %c0_0] : memref<8x32xbf16, #tpu.memory_space<vmem>>, vector<8x32xbf16>
    %c0_1 = arith.constant 0 : index
    %c0_2 = arith.constant 0 : index
    %1 = vector.load %arg2[%c0_1, %c0_2] : memref<32x256xbf16, #tpu.memory_space<vmem>>, vector<32x256xbf16>
    %cst = arith.constant dense<0.000000e+00> : vector<8x256xf32>
    %2 = tpu.matmul %0, %1, %cst {dimension_numbers = #tpu.dot_dimension_numbers<[1], [0], [0], [1], [0, 0, 1, 1], [], []>} : vector<8x32xbf16>, vector<32x256xbf16>, vector<8x256xf32> -> vector<8x256xf32>
    %c0_3 = arith.constant 0 : index
    %c0_4 = arith.constant 0 : index
    %3 = vector.load %arg3[%c0_3, %c0_4] : memref<1x256xf32, #tpu.memory_space<vmem>>, vector<1x256xf32>
    %4 = vector.broadcast %3 : vector<1x256xf32> to vector<8x256xf32>
    %5 = arith.addf %2, %4 : vector<8x256xf32>
    %cst_5 = arith.constant 0.00999999977 : f32
    %6 = vector.broadcast %cst_5 : f32 to vector<8x256xf32>
    %7 = arith.mulf %6, %5 : vector<8x256xf32>
    %8 = arith.maximumf %5, %7 : vector<8x256xf32>
    %9 = arith.truncf %8 : vector<8x256xf32> to vector<8x256xbf16>
    %c0_6 = arith.constant 0 : index
    %c0_7 = arith.constant 0 : index
    %10 = vector.load %arg4[%c0_6, %c0_7] : memref<256x128xbf16, #tpu.memory_space<vmem>>, vector<256x128xbf16>
    %cst_8 = arith.constant dense<0.000000e+00> : vector<8x128xf32>
    %11 = tpu.matmul %9, %10, %cst_8 {dimension_numbers = #tpu.dot_dimension_numbers<[1], [0], [0], [1], [0, 0, 1, 1], [], []>} : vector<8x256xbf16>, vector<256x128xbf16>, vector<8x128xf32> -> vector<8x128xf32>
    %c0_9 = arith.constant 0 : index
    %c0_10 = arith.constant 0 : index
    %12 = vector.load %arg5[%c0_9, %c0_10] : memref<1x128xf32, #tpu.memory_space<vmem>>, vector<1x128xf32>
    %13 = vector.broadcast %12 : vector<1x128xf32> to vector<8x128xf32>
    %14 = arith.addf %11, %13 : vector<8x128xf32>
    %cst_11 = arith.constant 0.00999999977 : f32
    %15 = vector.broadcast %cst_11 : f32 to vector<8x128xf32>
    %16 = arith.mulf %15, %14 : vector<8x128xf32>
    %17 = arith.maximumf %14, %16 : vector<8x128xf32>
    %18 = arith.truncf %17 : vector<8x128xf32> to vector<8x128xbf16>
    %c0_12 = arith.constant 0 : index
    %c0_13 = arith.constant 0 : index
    %19 = vector.load %arg6[%c0_12, %c0_13] : memref<128x8xbf16, #tpu.memory_space<vmem>>, vector<128x8xbf16>
    %cst_14 = arith.constant dense<0.000000e+00> : vector<8x8xf32>
    %20 = tpu.matmul %18, %19, %cst_14 {dimension_numbers = #tpu.dot_dimension_numbers<[1], [0], [0], [1], [0, 0, 1, 1], [], []>} : vector<8x128xbf16>, vector<128x8xbf16>, vector<8x8xf32> -> vector<8x8xf32>
    %c0_15 = arith.constant 0 : index
    %c0_16 = arith.constant 0 : index
    %21 = vector.load %arg7[%c0_15, %c0_16] : memref<1x8xf32, #tpu.memory_space<vmem>>, vector<1x8xf32>
    %22 = vector.broadcast %21 : vector<1x8xf32> to vector<8x8xf32>
    %23 = arith.addf %20, %22 : vector<8x8xf32>
    %24 = vector.extract_strided_slice %23 {offsets = [0, 0], sizes = [8, 3], strides = [1, 1]} : vector<8x8xf32> to vector<8x3xf32>
    %25 = vector.extract_strided_slice %23 {offsets = [0, 3], sizes = [8, 3], strides = [1, 1]} : vector<8x8xf32> to vector<8x3xf32>
    %cst_17 = arith.constant 0.000000e+00 : f32
    %26 = vector.broadcast %cst_17 : f32 to vector<8x3xf32>
    %27 = arith.maximumf %25, %26 : vector<8x3xf32>
    %28 = vector.extract_strided_slice %27 {offsets = [0, 0], sizes = [8, 1], strides = [1, 1]} : vector<8x3xf32> to vector<8x1xf32>
    %29 = vector.extract_strided_slice %27 {offsets = [0, 1], sizes = [8, 1], strides = [1, 1]} : vector<8x3xf32> to vector<8x1xf32>
    %30 = arith.addf %28, %29 : vector<8x1xf32>
    %31 = vector.extract_strided_slice %27 {offsets = [0, 2], sizes = [8, 1], strides = [1, 1]} : vector<8x3xf32> to vector<8x1xf32>
    %32 = arith.addf %30, %31 : vector<8x1xf32>
    %33 = tpu.concatenate %28, %30, %32 in 1 : vector<8x1xf32>, vector<8x1xf32>, vector<8x1xf32> -> vector<8x3xf32>
    %34 = arith.addf %24, %33 : vector<8x3xf32>
    %cst_18 = arith.constant 0.000000e+00 : f32
    %35 = vector.broadcast %cst_18 : f32 to vector<8x5xf32>
    %36 = tpu.concatenate %34, %35 in 1 : vector<8x3xf32>, vector<8x5xf32> -> vector<8x8xf32>
    %c0_19 = arith.constant 0 : index
    %c0_20 = arith.constant 0 : index
    %37 = vector.load %arg8[%c0_19, %c0_20] : memref<8x8xf32, #tpu.memory_space<vmem>>, vector<8x8xf32>
    tpu.vector_store %arg8[%c0_19, %c0_20], %36 {strides = array<i32>} : memref<8x8xf32, #tpu.memory_space<vmem>>, vector<8x8xf32>,
    return
  }
  func.func @transform_0(%arg0: i32) -> (i32, i32) {
    %c0_i32 = arith.constant 0 : i32
    %c0_i32_0 = arith.constant 0 : i32
    return %arg0, %c0_i32 : i32, i32
  }
  func.func @transform_1(%arg0: i32) -> (i32, i32) {
    %c0_i32 = arith.constant 0 : i32
    %c0_i32_0 = arith.constant 0 : i32
    %c0_i32_1 = arith.constant 0 : i32
    return %c0_i32, %c0_i32_0 : i32, i32
  }
  func.func @transform_2(%arg0: i32) -> (i32, i32) {
    %c0_i32 = arith.constant 0 : i32
    %c0_i32_0 = arith.constant 0 : i32
    %c0_i32_1 = arith.constant 0 : i32
    return %c0_i32, %c0_i32_0 : i32, i32
  }
  func.func @transform_3(%arg0: i32) -> (i32, i32) {
    %c0_i32 = arith.constant 0 : i32
    %c0_i32_0 = arith.constant 0 : i32
    %c0_i32_1 = arith.constant 0 : i32
    return %c0_i32, %c0_i32_0 : i32, i32
  }
  func.func @transform_4(%arg0: i32) -> (i32, i32) {
    %c0_i32 = arith.constant 0 : i32
    %c0_i32_0 = arith.constant 0 : i32
    %c0_i32_1 = arith.constant 0 : i32
    return %c0_i32, %c0_i32_0 : i32, i32
  }
  func.func @transform_5(%arg0: i32) -> (i32, i32) {
    %c0_i32 = arith.constant 0 : i32
    %c0_i32_0 = arith.constant 0 : i32
    %c0_i32_1 = arith.constant 0 : i32
    return %c0_i32, %c0_i32_0 : i32, i32
  }
  func.func @transform_6(%arg0: i32) -> (i32, i32) {
    %c0_i32 = arith.constant 0 : i32
    %c0_i32_0 = arith.constant 0 : i32
    %c0_i32_1 = arith.constant 0 : i32
    return %c0_i32, %c0_i32_0 : i32, i32
  }
  func.func @transform_7(%arg0: i32) -> (i32, i32) {
    %c0_i32 = arith.constant 0 : i32
    %c0_i32_0 = arith.constant 0 : i32
    return %arg0, %c0_i32 : i32, i32
  }
}

</mosaic_0001>

<bundles_post_ra>
// kernel: tpu_custom_call.1
= control target key start
LH: loop header
LB: loop body
LE: loop exit
PB: predicated region body
PF: predicated region fallthrough
CT: control target
= control target key end

     0   :  { %12 = vsyncpa [#allocation3], 0  ;;  %s756_s0 = inlined_call_operand.vmem [shape: bf16[8,32], index: 0, kind: input, shape index: {}]   ;;  %s757_s1 = inlined_call_operand.vmem [shape: bf16[32,256], index: 1, kind: input, shape index: {}]   ;;  %s758_s2 = inlined_call_operand.vmem [shape: f32[1,256], index: 2, kind: input, shape index: {}]   ;;  %s759_s3 = inlined_call_operand.hbm [shape: bf16[256,128], index: 3, kind: input, shape index: {}]   ;;  %s760_s4 = inlined_call_operand.vmem [shape: f32[1,128], index: 4, kind: input, shape index: {}]   ;;  %s761_s5 = inlined_call_operand.vmem [shape: bf16[128,8], index: 5, kind: input, shape index: {}]   ;;  %s762_s6 = inlined_call_operand.vmem [shape: f32[1,8], index: 6, kind: input, shape index: {}]   ;;  %s763_s7 = inlined_call_operand.hbm [shape: f32[8,8], index: 7, kind: output, shape index: {}]  }
   0x1   :  { %13 = vsyncpa [#allocation4], 0  ;;  %s634_s24 = smov [#allocation2]   ;;  %s586_s28 = scalar_lea.hbm %s759_s3, 2048 }
   0x2   :  { %s25_s25 = sshll.u32 %s634_s24, 4  ;;  %p587_p0 = scmp.ne.s32.totalorder %s759_s3, %s586_s28  ;;  %s26_s25 = int_to_ptr.vmem [resolvable:$true] %s25_s25 }
   0x3   :  { %p590_p1 = scmp.lt.u32.totalorder %s586_s28, %s759_s3 }
   0x5   :  { %p592_p2 = pnand %p590_p1, %p587_p0 }
   0x7   :  { %595 = shalt.err (!%p592_p2)
}
   0x8   :  { %s596_s10 = scalar_lea.vmem %s26_s25, 2048  ;;  %p601_p4 = scmp.lt.s32.totalorder %s26_s25, %s26_s25 }
   0x9   :  { %p597_p3 = scmp.ne.s32.totalorder %s26_s25, %s596_s10  ;;  %p602_p5 = scmp.lt.s32.totalorder %s596_s10, %s596_s10 }
   0xb   :  { %p603_p6 = por %p602_p5, %p601_p4 }
   0xd   :  { %p604_p7 = pnand %p603_p6, %p597_p3 }
   0xf   :  { %607 = shalt.err (!%p604_p7)
}
  0x10   :  { %s635_s11 = smov 64   ;;  %s636_s12 = smov 4  }
  0x11   :  { %31 = dma.hbm_to_vmem [thread:$0]  %s759_s3, 2048, %s26_s25, [#allocation3], %s635_s11, %s635_s11, %s636_s12  }
  0x12   :  { %630 = dma.done.wait [#allocation3], 2048  }
  0x13   :  { %631 = vsyncadd [#allocation3], 4294965248  ;;  %v637_v0 = vmov 0   ;;  %v556_v1 = vld [vmem:[%s757_s1 + $0x4] ss:$8 sps:$4 sm:$0xff]   ;;  %vm79_vm0 = vcmask 261120   ;;  %v49_v28 = vlaneseq }
  0x14   :  { %115 = vmatprep.mubr.bf16.mxu0 %v637_v0  ;;  %v558_v2 = vld [vmem:[%s757_s1] ss:$8 sps:$4 sm:$0xff]   ;;  %83 = vmatprep.subr.bf16.mxu0 %v556_v1  ;;  %v559_v3 = vld [vmem:[%s757_s1 + $0x14] ss:$8 sps:$4 sm:$0xff]   ;;  %v561_v4 = vld [vmem:[%s757_s1 + $0x10] ss:$8 sps:$4 sm:$0xff]  }
  0x15   :  { %84 = vmatpush1.bf16.msra.mxu0 %v558_v2  ;;  %v562_v5 = vld [vmem:[#allocation2 + $0x40] sm:$0xff]   ;;  %v564_v8 = vld [vmem:[#allocation2 + $0x48] sm:$0xff]   ;;  %v566_v10 = vld [vmem:[#allocation2 + $0x50] sm:$0xff]   ;;  %v638_v23 = vmov 0.0   ;;  %v50_v29 = vshrl.u32 %v49_v28, 7  ;;  %vm639_vm1 = vmmov 0  }
  0x16   :  { %85 = vmatprep.subr.bf16.mxu0 %v559_v3  ;;  %v563_v6 = vld [vmem:[#allocation2] sm:$0xff]   ;;  %495 = vmatprep.subr.bf16.mxu1 %v562_v5  ;;  %v565_v9 = vld [vmem:[#allocation2 + $0x8] sm:$0xff]   ;;  %v567_v11 = vld [vmem:[#allocation2 + $0x10] sm:$0xff]   ;;  %s642_s20 = smov 126   ;;  %vm440_vm2 = vcmask 7168   ;;  %vm442_vm3 = vcmask 15360  }
  0x17   :  { %v42_v7 = vld [vmem:[%s756_s0] sm:$0xf]  ;;  %496 = vmatpush3.bf16.msra.mxu1 %v563_v6  ;;  %v568_v12 = vld [vmem:[#allocation2 + $0x58] sm:$0xff]   ;;  %v572_v16 = vld [vmem:[#allocation2 + $0x68] sm:$0xff]   ;;  %v51_v30 = vsub.s32 0, %v50_v29  ;;  %v55_v32 = vsub.s32 1, %v50_v29 }
  0x18   :  { %497 = vmatprep.subr.bf16.mxu1 %v564_v8  ;;  %v569_v13 = vld [vmem:[#allocation2 + $0x18] sm:$0xff]   ;;  %v570_v14 = vld [vmem:[#allocation2 + $0x60] sm:$0xff]   ;;  %v573_v17 = vld [vmem:[#allocation2 + $0x28] sm:$0xff]   ;;  %vm445_vm4 = vcmask 23552   ;;  %vm447_vm5 = vcmask 64512  }
  0x19   :  { %86 = vmatpush1.bf16.msra.mxu0 %v561_v4  ;;  %v571_v15 = vld [vmem:[#allocation2 + $0x20] sm:$0xff]   ;;  %v574_v18 = vld [vmem:[#allocation2 + $0x70] sm:$0xff]   ;;  %v576_v20 = vld [vmem:[#allocation2 + $0x78] sm:$0xff]  }
  0x1a   :  { %v575_v19 = vld [vmem:[#allocation2 + $0x30] sm:$0xff]   ;;  %v577_v21 = vld [vmem:[#allocation2 + $0x38] sm:$0xff]   ;;  %v578_v22 = vld [vmem:[%s761_s5] sm:$0xff]   ;;  %526 = vmatprep.subr.bf16.mxu0 %v638_v23 }
  0x1b   :  { %498 = vmatpush3.bf16.msra.mxu1 %v565_v9  ;;  %v579_v24 = vld [vmem:[%s761_s5 + $0x8] sm:$0xff]   ;;  %v580_v25 = vld [vmem:[%s761_s5 + $0x10] sm:$0xff]   ;;  %v581_v26 = vld [vmem:[%s761_s5 + $0x18] sm:$0xff]  }
  0x1c   :  { %468 = vmatmul.mubr.msk.bf16.vlgmr.msra.gmra.mrb[0].mxu0 %vm79_vm0, %v42_v7  ;;  %499 = vmatprep.subr.bf16.mxu1 %v566_v10  ;;  %v582_v27 = vld [vmem:[%s761_s5 + $0x20] sm:$0xff]   ;;  %v583_v47 = vld [vmem:[%s761_s5 + $0x28] sm:$0xff]   ;;  %v584_v48 = vld [vmem:[%s761_s5 + $0x30] sm:$0xff]  }
  0x1d   :  { %527 = vmatpush3.bf16.msra.mxu0 %v578_v22  ;;  %v47_v31 = vld [vmem:[%s758_s2] sm:$0x3]  ;;  %v585_v49 = vld [vmem:[%s761_s5 + $0x38] sm:$0xff]   ;;  %542 = vmatprep.mubr.msk.bf16.mxu0 %vm639_vm1, %v638_v23  ;;  %s641_s5 = smov 127  }
  0x1e   :  { %528 = vmatprep.subr.bf16.mxu0 %v638_v23  ;;  %v52_v33 = vrot.slane %v47_v31, %v51_v30  ;;  %v56_v34 = vrot.slane %v47_v31, %v55_v32  ;;  %v469_v51 = vld [vmem:[%s760_s4] ss:$0 sm:$0xff]  ;;  %s640_s4 = smov 125  }
  0x1f   :  { %500 = vmatpush3.bf16.msra.mxu1 %v567_v11  ;;  %v486_v60 = vld [vmem:[%s762_s6] ss:$0 sm:$0xff]  ;;  %s643_s6 = smov [#allocation5]  }
  0x20   :  { %501 = vmatprep.subr.bf16.mxu1 %v568_v12  ;;  %s455_s21 = sshll.u32 %s643_s6, 4  ;;  %s456_s21 = int_to_ptr.vmem [resolvable:$true] %s455_s21 }
  0x21   :  { %529 = vmatpush3.bf16.msra.mxu0 %v579_v24  ;;  %s608_s22 = scalar_lea.vmem %s456_s21, 128  ;;  %p613_p9 = scmp.lt.s32.totalorder %s456_s21, %s456_s21 }
  0x22   :  { %530 = vmatprep.subr.bf16.mxu0 %v638_v23  ;;  %p609_p8 = scmp.ne.s32.totalorder %s456_s21, %s608_s22  ;;  %p614_p10 = scmp.lt.s32.totalorder %s608_s22, %s608_s22 }
  0x23   :  { %502 = vmatpush3.bf16.msra.mxu1 %v569_v13 }
  0x24   :  { %503 = vmatprep.subr.bf16.mxu1 %v570_v14  ;;  %p615_p11 = por %p614_p10, %p613_p9 }
  0x25   :  { %531 = vmatpush3.bf16.msra.mxu0 %v580_v25 }
  0x26   :  { %532 = vmatprep.subr.bf16.mxu0 %v638_v23  ;;  %p616_p12 = pnand %p615_p11, %p609_p8 }
  0x27   :  { %504 = vmatpush3.bf16.msra.mxu1 %v571_v15 }
  0x28   :  { %505 = vmatprep.subr.bf16.mxu1 %v572_v16 }
  0x29   :  { %533 = vmatpush3.bf16.msra.mxu0 %v581_v26 }
  0x2a   :  { %534 = vmatprep.subr.bf16.mxu0 %v638_v23 }
  0x2b   :  { %506 = vmatpush3.bf16.msra.mxu1 %v573_v17 }
  0x2c   :  { %507 = vmatprep.subr.bf16.mxu1 %v574_v18 }
  0x2d   :  { %535 = vmatpush3.bf16.msra.mxu0 %v582_v27 }
  0x2e   :  { %536 = vmatprep.subr.bf16.mxu0 %v638_v23 }
  0x2f   :  { %508 = vmatpush3.bf16.msra.mxu1 %v575_v19 }
  0x30   :  { %509 = vmatprep.subr.bf16.mxu1 %v576_v20 }
  0x31   :  { %537 = vmatpush3.bf16.msra.mxu0 %v583_v47 }
  0x32   :  { %538 = vmatprep.subr.bf16.mxu0 %v638_v23 }
  0x33   :  { %510 = vmatpush3.bf16.msra.mxu1 %v577_v21 }
  0x35   :  { %539 = vmatpush3.bf16.msra.mxu0 %v584_v48 }
  0x36   :  { %540 = vmatprep.subr.bf16.mxu0 %v638_v23 }
  0x39   :  { %541 = vmatpush3.bf16.msra.mxu0 %v585_v49 }
  0xef   :  { %v117_v35 = vpop.f32.mrb[0].mxu0 }
  0xf0   :  { %v118_v36 = vadd.f32 %v117_v35, %v52_v33  ;;  %v119_v37 = vpop.f32.mrb[1].mxu0 }
  0xf1   :  { %v120_v38 = vadd.f32 %v119_v37, %v56_v34  ;;  %v121_v39 = vpop.f32.mrb[2].mxu0 }
  0xf2   :  { %v124_v40 = vmul.f32 0.01, %v118_v36  ;;  %v122_v41 = vpop.f32.mrb[3].mxu0 }
  0xf3   :  { %v125_v42 = vmul.f32 0.01, %v120_v38 }
  0xf4   :  { %v126_v43 = vmax.f32 %v118_v36, %v124_v40 }
  0xf5   :  { %v127_v44 = vmax.f32 %v120_v38, %v125_v42 }
  0xf6   :  { %v128_v46 = vpack.c.bf16 %v126_v43, %v126_v43 }
  0xf7   :  { %v129_v45 = vpack.c.bf16 %v127_v44, %v127_v44 }
  0xf9   :  { %297 = vmatprep.mubr.bf16.mxu1 %v129_v45 }
  0xfa   :  { %298 = vmatmul.mubr.bf16.vlgmr.msra.gmra.mrb[0].mxu1 %v128_v46 }
 0x1cd   :  { %v511_v50 = vpop.f32.mrb[0].mxu1 }
 0x1ce   :  { %v512_v52 = vpop.f32.mrb[1].mxu1 }
 0x1cf   :  { %v513_v53 = vadd.f32 %v512_v52, %v511_v50  ;;  %v514_v54 = vpop.f32.mrb[2].mxu1 }
 0x1d0   :  { %v515_v55 = vpop.f32.mrb[3].mxu1 }
 0x1d1   :  { %v300_v56 = vadd.f32 %v513_v53, %v469_v51 }
 0x1d3   :  { %v305_v57 = vmul.f32 0.01, %v300_v56 }
 0x1d5   :  { %v306_v58 = vmax.f32 %v300_v56, %v305_v57 }
 0x1d7   :  { %v307_v59 = vpack.c.bf16 %v306_v58, %v306_v58 }
 0x1d9   :  { %543 = vmatmul.mubr.bf16.vlgmr.msra.gmra.mrb[4].mxu0 %v307_v59 }
 0x2ac   :  { %v413_v61 = vpop.f32.mrb[4].mxu0 }
 0x2ad   :  { %v414_v62 = vadd.f32 %v486_v60, %v413_v61  ;;  %v544_v63 = vpop.f32.mrb[5].mxu0 }
 0x2ae   :  { %v416_v0 = vpop.f32.mrb[6].mxu0 }
 0x2af   :  { %v419_v1 = vmax.f32 %v414_v62, 0.0  ;;  %v545_v2 = vpop.f32.mrb[7].mxu0 }
 0x2b1   :  { %429 = vrot.lane.b32.xlu1 %v419_v1, %s640_s4  ;;  %421 = vrot.lane.b32.xlu0 %v419_v1, %s641_s5 }
 0x2b5   :  { %425 = vrot.lane.b32.xlu0 %v419_v1, %s642_s20 }
 0x323   :  { %v422_v3 = vpop.permute.xlu0 %421  ;;  %v430_v7 = vpop.permute.xlu1 %429 }
 0x324   :  { %v424_v4 = vadd.f32 %v422_v3, %v419_v1 }
 0x326   :  { %433 = vrot.lane.b32.xlu1 %v424_v4, %s642_s20 }
 0x327   :  { %v426_v5 = vpop.permute.xlu0 %425 }
 0x328   :  { %v428_v6 = vadd.f32 %v426_v5, %v424_v4 }
 0x32a   :  { %437 = vrot.lane.b32.xlu0 %v428_v6, %s641_s5 }
 0x398   :  { %v434_v8 = vpop.permute.xlu1 %433 }
 0x399   :  { %v441_v9 = vsel %vm440_vm2, %v430_v7, %v434_v8 }
 0x39c   :  { %v438_v10 = vpop.permute.xlu0 %437 }
 0x39d   :  { %v443_v11 = vsel %vm442_vm3, %v441_v9, %v438_v10 }
 0x39e   :  { %v444_v12 = vadd.f32 %v443_v11, %v414_v62 }
 0x3a0   :  { %v446_v13 = vsel %vm445_vm4, %v444_v12, 0.0 }
 0x3a1   :  { %448 = vst.msk [vmem:[#allocation5] sm:$0xff] %vm447_vm5, %v446_v13 }
 0x3a2   :  { %619 = shalt.err (!%p616_p12)
}
 0x3a3   :  { %s620_s0 = scalar_lea.hbm %s763_s7, 128 }
 0x3a4   :  { %p621_p13 = scmp.ne.s32.totalorder %s763_s7, %s620_s0  ;;  %p624_p0 = scmp.lt.u32.totalorder %s620_s0, %s763_s7 }
 0x3a6   :  { %p626_p1 = pnand %p624_p0, %p621_p13 }
 0x3a8   :  { %629 = shalt.err (!%p626_p1)
}
 0x3a9   :  { %458 = dma.vmem_to_hbm [thread:$0]  %s456_s21, 128, %s763_s7, [#allocation4]  }
 0x3aa   :  { %632 = dma.done.wait [#allocation4], 128  }
 0x3ab   :  { %633 = vsyncadd [#allocation4], 4294967168 }
 0x3ac   :  { %462 = vsyncpa [#allocation3], 1 }
 0x3ad   :  { %463 = vsyncpa [#allocation4], 1 }

</bundles_post_ra>
